<compile_context>
chip_gen: v7x
topology: tpu7x:2x2x1
jax: 0.10.0
libtpu: 0.0.40
codegen_flags: <defaults>
</compile_context>

<pallas_src>
import functools

import jax
import jax.numpy as jnp
from jax import lax
from jax.experimental import pallas as pl
from jax.experimental.pallas import tpu as pltpu

EPS = 1e-5  # nn.BatchNorm1d default


def _round_up(x, m):
    return ((x + m - 1) // m) * m


def _nbytes(a):
    return a.size * a.dtype.itemsize


def _device_kind():
    try:
        return jax.devices()[0].device_kind.lower()
    except Exception:
        return ""


def _pick_batch_tile(B, INPp, HIDp, OUTp, mm_bytes, h_bytes, budget, cap):
    """Largest batch tile (multiple of 8) whose per-pass VMEM footprint fits."""
    tb = min(_round_up(cap, 8), _round_up(B, 8))
    while tb > 8:
        p1 = (2 * tb * INPp * mm_bytes          # x tile, double-buffered
              + INPp * HIDp * mm_bytes          # W1 resident, single-buffered
              + 3 * HIDp * 4                    # b1 + sum + sumsq
              + 2 * tb * HIDp * h_bytes)        # h tile out, double-buffered
        p2 = (2 * tb * HIDp * h_bytes           # h tile in
              + 2 * HIDp * 4                    # scale + shift
              + HIDp * OUTp * mm_bytes          # W2 resident
              + OUTp * 4                        # b2
              + 2 * tb * OUTp * 4)              # out tile
        if max(p1, p2) <= budget:
            break
        tb = _round_up(tb // 2, 8)
    return max(tb, 8)


# --------------------- pass 1: Linear(inp->hid) + batch statistics ----------

def _hidden_stats_kernel(x_ref, w1_ref, b1_ref, h_ref, sum_ref, sumsq_ref):
    t = pl.program_id(1)                         # inner (accumulation) axis

    # f32 accumulation on the MXU regardless of the matmul input dtype.
    h = jnp.dot(x_ref[...], w1_ref[...],
                preferred_element_type=jnp.float32) + b1_ref[...]   # (TB, H) f32

    @pl.when(t == 0)
    def _():
        sum_ref[...] = jnp.zeros_like(sum_ref)
        sumsq_ref[...] = jnp.zeros_like(sumsq_ref)

    # fused single-pass stats in f32 BEFORE the (possibly bf16) store of h.
    sum_ref[...] += jnp.sum(h, axis=0, keepdims=True)
    sumsq_ref[...] += jnp.sum(h * h, axis=0, keepdims=True)

    h_ref[...] = h.astype(h_ref.dtype)


# ------ pass 2: BatchNorm (prefolded scale/shift) + PReLU + Linear(hid->out) -

def _bn_prelu_out_kernel(h_ref, scale_ref, shift_ref, alpha_ref,
                         w2_ref, b2_ref, o_ref, *, compute_dtype):
    hn = h_ref[...].astype(jnp.float32) * scale_ref[...] + shift_ref[...]
    a = alpha_ref[0]                             # PReLU scalar from SMEM
    act = jnp.where(hn > 0, hn, a * hn)
    o_ref[...] = (jnp.dot(act.astype(compute_dtype), w2_ref[...],
                          preferred_element_type=jnp.float32)
                  + b2_ref[...]).astype(o_ref.dtype)


# ------------------------------- wrapper -------------------------------------

def mlp_forward(x, params, *, compute_dtype=jnp.bfloat16, block_b=None,
                num_stat_shards=2):
    w1, b1, gamma, beta, alpha, w2, b2 = params
    B, INP = x.shape
    HID = w1.shape[1]
    OUT = w2.shape[1]

    # MXU / lane friendly padded sizes
    INPp = _round_up(INP, 128)
    HIDp = _round_up(HID, 128)
    OUTp = _round_up(OUT, 128)

    # generation-aware VMEM budget / tile cap
    kind = _device_kind()
    is_v7 = "v7" in kind
    vmem_limit = (48 if is_v7 else 100) * 1024 * 1024   # v7x: 64 MiB physical
    cap = block_b if block_b is not None else (1024 if is_v7 else 2048)

    mm_bytes = jnp.dtype(compute_dtype).itemsize
    h_dtype = compute_dtype                      # intermediate stored narrow
    h_bytes = jnp.dtype(h_dtype).itemsize
    TB = _pick_batch_tile(B, INPp, HIDp, OUTp, mm_bytes, h_bytes,
                          int(vmem_limit * 0.8), cap)

    # one stats shard per TensorCore (v7x megacore recovers pass-1 parallelism)
    n_shards = num_stat_shards if B > TB else 1
    Bp = _round_up(B, n_shards * TB)
    n_tiles = Bp // TB
    tps = n_tiles // n_shards                    # tiles per shard

    # zero padding is mathematically inert: padded input columns contribute 0,
    # padded hidden columns stay exactly 0 through BN/PReLU/matmul2, padded
    # batch rows are corrected out of the stats and sliced off the output.
    xp = jnp.pad(x, ((0, Bp - B), (0, INPp - INP))).astype(compute_dtype)
    w1p = jnp.pad(w1, ((0, INPp - INP), (0, HIDp - HID))).astype(compute_dtype)
    b1p = jnp.pad(b1, ((0, 0), (0, HIDp - HID))).astype(jnp.float32)
    w2p = jnp.pad(w2, ((0, HIDp - HID), (0, OUTp - OUT))).astype(compute_dtype)
    b2p = jnp.pad(b2, ((0, 0), (0, OUTp - OUT))).astype(jnp.float32)
    gammap = jnp.pad(gamma, ((0, 0), (0, HIDp - HID))).astype(jnp.float32)
    betap = jnp.pad(beta, ((0, 0), (0, HIDp - HID))).astype(jnp.float32)
    alpha_s = jnp.reshape(alpha, (1,)).astype(jnp.float32)

    once = pl.Buffered(1)                        # resident: DMA once, 1 buffer
    const2 = lambda s, t: (0, 0)
    row2 = lambda s, t: (s * tps + t, 0)
    shard2 = lambda s, t: (s, 0)

    # ---- pass 1: hidden pre-activations + fused per-shard sum / sumsq -------
    h, psum, psumsq = pl.pallas_call(
        _hidden_stats_kernel,
        grid=(n_shards, tps),
        in_specs=[
            pl.BlockSpec((TB, INPp), row2),                          # x tile
            pl.BlockSpec((INPp, HIDp), const2, pipeline_mode=once),  # W1
            pl.BlockSpec((1, HIDp), const2, pipeline_mode=once),     # b1
        ],
        out_specs=[
            pl.BlockSpec((TB, HIDp), row2),                          # h tile
            pl.BlockSpec((1, HIDp), shard2),                         # sum
            pl.BlockSpec((1, HIDp), shard2),                         # sumsq
        ],
        out_shape=[
            jax.ShapeDtypeStruct((Bp, HIDp), h_dtype),
            jax.ShapeDtypeStruct((n_shards, HIDp), jnp.float32),
            jax.ShapeDtypeStruct((n_shards, HIDp), jnp.float32),
        ],
        compiler_params=pltpu.CompilerParams(
            dimension_semantics=("parallel", "arbitrary"),
            vmem_limit_bytes=vmem_limit),
        cost_estimate=pl.CostEstimate(
            flops=2 * Bp * INPp * HIDp,
            transcendentals=0,
            bytes_accessed=(_nbytes(xp) + _nbytes(w1p) + _nbytes(b1p)
                            + Bp * HIDp * h_bytes + 2 * n_shards * HIDp * 4)),
    )(xp, w1p, b1p)

    # ---- fold BN scale/shift ONCE in the wrapper (tiny (1, HIDp) math) ------
    n_pad = Bp - B
    total_sum = jnp.sum(psum, axis=0, keepdims=True)
    total_sumsq = jnp.sum(psumsq, axis=0, keepdims=True)
    if n_pad:
        # zero-padded batch rows produce exactly h = b1, remove analytically
        total_sum = total_sum - n_pad * b1p
        total_sumsq = total_sumsq - n_pad * (b1p * b1p)
    mean = total_sum / B
    # TODO(synk): E[h^2]-mean^2 can cancel for features whose mean dwarfs the
    # spread; switch to a shifted accumulation if such inputs are expected.
    var = total_sumsq / B - mean * mean          # biased train-mode estimate
    scale = gammap * lax.rsqrt(var + EPS)
    shift = betap - mean * scale

    # ---- pass 2: BN (prefolded) + PReLU + output Linear ---------------------
    k2 = functools.partial(_bn_prelu_out_kernel, compute_dtype=compute_dtype)
    row1 = lambda i: (i, 0)
    const1 = lambda i: (0, 0)
    out = pl.pallas_call(
        k2,
        grid=(n_tiles,),
        in_specs=[
            pl.BlockSpec((TB, HIDp), row1),                          # h tile
            pl.BlockSpec((1, HIDp), const1, pipeline_mode=once),     # scale
            pl.BlockSpec((1, HIDp), const1, pipeline_mode=once),     # shift
            pl.BlockSpec(memory_space=pltpu.MemorySpace.SMEM),       # alpha
            pl.BlockSpec((HIDp, OUTp), const1, pipeline_mode=once),  # W2
            pl.BlockSpec((1, OUTp), const1, pipeline_mode=once),     # b2
        ],
        out_specs=pl.BlockSpec((TB, OUTp), row1),
        out_shape=jax.ShapeDtypeStruct((Bp, OUTp), jnp.float32),
        compiler_params=pltpu.CompilerParams(
            dimension_semantics=("parallel",),
            vmem_limit_bytes=vmem_limit),
        cost_estimate=pl.CostEstimate(
            flops=2 * Bp * HIDp * OUTp + 6 * Bp * HIDp,
            transcendentals=0,
            bytes_accessed=(Bp * HIDp * h_bytes + 2 * HIDp * 4 + 4
                            + _nbytes(w2p) + _nbytes(b2p) + Bp * OUTp * 4)),
    )(h, scale, shift, alpha_s, w2p, b2p)

    return out[:B, :OUT]


# ------------------------------ test harness ---------------------------------

def init_params(key, inp_size, hidden_size, outp_size):
    """Deterministic parameter init mimicking PyTorch defaults (shapes only)."""
    k1, k2, k3, k4 = jax.random.split(key, 4)
    bound1 = 1.0 / jnp.sqrt(inp_size)
    bound2 = 1.0 / jnp.sqrt(hidden_size)
    # stored transposed: (in, out)
    w1 = jax.random.uniform(k1, (inp_size, hidden_size), jnp.float32,
                            -bound1, bound1)
    b1 = jax.random.uniform(k2, (1, hidden_size), jnp.float32, -bound1, bound1)
    gamma = jnp.ones((1, hidden_size), jnp.float32)   # BatchNorm weight
    beta = jnp.zeros((1, hidden_size), jnp.float32)   # BatchNorm bias
    alpha = jnp.full((1, 1), 0.25, jnp.float32)       # PReLU default init
    w2 = jax.random.uniform(k3, (hidden_size, outp_size), jnp.float32,
                            -bound2, bound2)
    b2 = jax.random.uniform(k4, (1, outp_size), jnp.float32, -bound2, bound2)
    return (w1, b1, gamma, beta, alpha, w2, b2)


def mlp_reference(x, params):
    w1, b1, gamma, beta, alpha, w2, b2 = params
    h = x @ w1 + b1
    mean = jnp.mean(h, axis=0, keepdims=True)
    var = jnp.mean((h - mean) ** 2, axis=0, keepdims=True)
    h = (h - mean) / jnp.sqrt(var + EPS) * gamma + beta
    h = jnp.where(h > 0, h, alpha[0, 0] * h)
    return h @ w2 + b2


if __name__ == "__main__":
    B, INP, HID, OUT = 8, 16, 32, 8
    key = jax.random.PRNGKey(0)
    kx, kp = jax.random.split(key)
    x = jax.random.normal(kx, (B, INP), jnp.float32)
    params = init_params(kp, INP, HID, OUT)

    ref = mlp_reference(x, params)

    # f32 MXU path — matches the reference tightly
    out_f32 = mlp_forward(x, params, compute_dtype=jnp.float32)
    jax.block_until_ready(out_f32)
    assert out_f32.shape == (B, OUT)
    assert jnp.allclose(out_f32, ref, atol=1e-4, rtol=1e-4)

    # default path: bf16 matmul inputs + bf16 h intermediate, f32 accumulation
    # and f32 BN statistics (stats reduced before the narrow store).
    out_bf16 = mlp_forward(x, params)
    jax.block_until_ready(out_bf16)
    assert out_bf16.shape == (B, OUT)
    assert float(jnp.max(jnp.abs(out_bf16 - ref))) < 2e-1

    print("KERNEL_OK")
</pallas_src>

<mosaic_0001>
module attributes {stable_mosaic.version = 11 : i64} {
  func.func @_hidden_stats_kernel(%arg0: i32, %arg1: i32, %arg2: memref<8x128xf32, #tpu.memory_space<vmem>>, %arg3: memref<128x128xf32, #tpu.memory_space<vmem>>, %arg4: memref<1x128xf32, #tpu.memory_space<vmem>>, %arg5: memref<8x128xf32, #tpu.memory_space<vmem>>, %arg6: memref<1x128xf32, #tpu.memory_space<vmem>>, %arg7: memref<1x128xf32, #tpu.memory_space<vmem>>) attributes {dimension_semantics = [#tpu.dimension_semantics<parallel>, #tpu.dimension_semantics<arbitrary>], iteration_bounds = array<i64: 1, 1>, scalar_prefetch = 0 : i64, scratch_operands = 0 : i64, tpu.core_type = #tpu.core_type<tc>, window_params = [{transform_indices = @transform_0, window_bounds = array<i64: 8, 128>}, {pipeline_mode = #tpu.pipeline_mode<synchronous>, transform_indices = @transform_1, window_bounds = array<i64: 128, 128>}, {pipeline_mode = #tpu.pipeline_mode<synchronous>, transform_indices = @transform_2, window_bounds = array<i64: 1, 128>}, {transform_indices = @transform_3, window_bounds = array<i64: 8, 128>}, {transform_indices = @transform_4, window_bounds = array<i64: 1, 128>}, {transform_indices = @transform_5, window_bounds = array<i64: 1, 128>}]} {
    %c0 = arith.constant 0 : index
    %c0_0 = arith.constant 0 : index
    %0 = vector.load %arg2[%c0, %c0_0] : memref<8x128xf32, #tpu.memory_space<vmem>>, vector<8x128xf32>
    %c0_1 = arith.constant 0 : index
    %c0_2 = arith.constant 0 : index
    %1 = vector.load %arg3[%c0_1, %c0_2] : memref<128x128xf32, #tpu.memory_space<vmem>>, vector<128x128xf32>
    %cst = arith.constant dense<0.000000e+00> : vector<8x128xf32>
    %2 = tpu.matmul %0, %1, %cst {dimension_numbers = #tpu.dot_dimension_numbers<[1], [0], [0], [1], [0, 0, 1, 1], [], []>} : vector<8x128xf32>, vector<128x128xf32>, vector<8x128xf32> -> vector<8x128xf32>
    %c0_3 = arith.constant 0 : index
    %c0_4 = arith.constant 0 : index
    %3 = vector.load %arg4[%c0_3, %c0_4] : memref<1x128xf32, #tpu.memory_space<vmem>>, vector<1x128xf32>
    %4 = vector.broadcast %3 : vector<1x128xf32> to vector<8x128xf32>
    %5 = arith.addf %2, %4 : vector<8x128xf32>
    %c0_i32 = arith.constant 0 : i32
    %6 = arith.cmpi eq, %arg1, %c0_i32 : i32
    %7 = arith.extui %6 : i1 to i32
    %c0_i32_5 = arith.constant 0 : i32
    %8 = arith.cmpi ne, %7, %c0_i32_5 : i32
    scf.if %8 {
      %cst_18 = arith.constant 0.000000e+00 : f32
      %21 = vector.broadcast %cst_18 : f32 to vector<1x128xf32>
      %c0_19 = arith.constant 0 : index
      %c0_20 = arith.constant 0 : index
      %22 = vector.load %arg6[%c0_19, %c0_20] : memref<1x128xf32, #tpu.memory_space<vmem>>, vector<1x128xf32>
      tpu.vector_store %arg6[%c0_19, %c0_20], %21 {strides = array<i32>} : memref<1x128xf32, #tpu.memory_space<vmem>>, vector<1x128xf32>,
      %cst_21 = arith.constant 0.000000e+00 : f32
      %23 = vector.broadcast %cst_21 : f32 to vector<1x128xf32>
      %c0_22 = arith.constant 0 : index
      %c0_23 = arith.constant 0 : index
      %24 = vector.load %arg7[%c0_22, %c0_23] : memref<1x128xf32, #tpu.memory_space<vmem>>, vector<1x128xf32>
      tpu.vector_store %arg7[%c0_22, %c0_23], %23 {strides = array<i32>} : memref<1x128xf32, #tpu.memory_space<vmem>>, vector<1x128xf32>,
    } else {
    }
    %c0_6 = arith.constant 0 : index
    %c0_7 = arith.constant 0 : index
    %9 = vector.load %arg6[%c0_6, %c0_7] : memref<1x128xf32, #tpu.memory_space<vmem>>, vector<1x128xf32>
    %cst_8 = arith.constant dense<0.000000e+00> : vector<128xf32>
    %10 = vector.multi_reduction <add>, %5, %cst_8 [0] : vector<8x128xf32> to vector<128xf32>
    %11 = vector.shape_cast %10 : vector<128xf32> to vector<1x128xf32>
    %12 = arith.addf %9, %11 : vector<1x128xf32>
    %c0_9 = arith.constant 0 : index
    %c0_10 = arith.constant 0 : index
    %13 = vector.load %arg6[%c0_9, %c0_10] : memref<1x128xf32, #tpu.memory_space<vmem>>, vector<1x128xf32>
    tpu.vector_store %arg6[%c0_9, %c0_10], %12 {strides = array<i32>} : memref<1x128xf32, #tpu.memory_space<vmem>>, vector<1x128xf32>,
    %c0_11 = arith.constant 0 : index
    %c0_12 = arith.constant 0 : index
    %14 = vector.load %arg7[%c0_11, %c0_12] : memref<1x128xf32, #tpu.memory_space<vmem>>, vector<1x128xf32>
    %15 = arith.mulf %5, %5 : vector<8x128xf32>
    %cst_13 = arith.constant dense<0.000000e+00> : vector<128xf32>
    %16 = vector.multi_reduction <add>, %15, %cst_13 [0] : vector<8x128xf32> to vector<128xf32>
    %17 = vector.shape_cast %16 : vector<128xf32> to vector<1x128xf32>
    %18 = arith.addf %14, %17 : vector<1x128xf32>
    %c0_14 = arith.constant 0 : index
    %c0_15 = arith.constant 0 : index
    %19 = vector.load %arg7[%c0_14, %c0_15] : memref<1x128xf32, #tpu.memory_space<vmem>>, vector<1x128xf32>
    tpu.vector_store %arg7[%c0_14, %c0_15], %18 {strides = array<i32>} : memref<1x128xf32, #tpu.memory_space<vmem>>, vector<1x128xf32>,
    %c0_16 = arith.constant 0 : index
    %c0_17 = arith.constant 0 : index
    %20 = vector.load %arg5[%c0_16, %c0_17] : memref<8x128xf32, #tpu.memory_space<vmem>>, vector<8x128xf32>
    tpu.vector_store %arg5[%c0_16, %c0_17], %5 {strides = array<i32>} : memref<8x128xf32, #tpu.memory_space<vmem>>, vector<8x128xf32>,
    return
  }
  func.func @transform_0(%arg0: i32, %arg1: i32) -> (i32, i32) {
    %c1_i32 = arith.constant 1 : i32
    %0 = arith.muli %arg0, %c1_i32 : i32
    %1 = arith.addi %0, %arg1 : i32
    %c0_i32 = arith.constant 0 : i32
    %c0_i32_0 = arith.constant 0 : i32
    return %1, %c0_i32 : i32, i32
  }
  func.func @transform_1(%arg0: i32, %arg1: i32) -> (i32, i32) {
    %c0_i32 = arith.constant 0 : i32
    %c0_i32_0 = arith.constant 0 : i32
    %c0_i32_1 = arith.constant 0 : i32
    return %c0_i32, %c0_i32_0 : i32, i32
  }
  func.func @transform_2(%arg0: i32, %arg1: i32) -> (i32, i32) {
    %c0_i32 = arith.constant 0 : i32
    %c0_i32_0 = arith.constant 0 : i32
    %c0_i32_1 = arith.constant 0 : i32
    return %c0_i32, %c0_i32_0 : i32, i32
  }
  func.func @transform_3(%arg0: i32, %arg1: i32) -> (i32, i32) {
    %c1_i32 = arith.constant 1 : i32
    %0 = arith.muli %arg0, %c1_i32 : i32
    %1 = arith.addi %0, %arg1 : i32
    %c0_i32 = arith.constant 0 : i32
    %c0_i32_0 = arith.constant 0 : i32
    return %1, %c0_i32 : i32, i32
  }
  func.func @transform_4(%arg0: i32, %arg1: i32) -> (i32, i32) {
    %c0_i32 = arith.constant 0 : i32
    %c0_i32_0 = arith.constant 0 : i32
    return %arg0, %c0_i32 : i32, i32
  }
  func.func @transform_5(%arg0: i32, %arg1: i32) -> (i32, i32) {
    %c0_i32 = arith.constant 0 : i32
    %c0_i32_0 = arith.constant 0 : i32
    return %arg0, %c0_i32 : i32, i32
  }
}

</mosaic_0001>

<bundles_post_ra>
// kernel: tpu_custom_call.1
= control target key start
LH: loop header
LB: loop body
LE: loop exit
PB: predicated region body
PF: predicated region fallthrough
CT: control target
= control target key end

     0   :  { %11 = vsyncpa [#allocation3], 0  ;;  %s576_s0 = inlined_call_operand.hbm [shape: f32[8,128], index: 0, kind: input, shape index: {}]   ;;  %s577_s1 = inlined_call_operand.hbm [shape: f32[128,128], index: 1, kind: input, shape index: {}]   ;;  %s578_s2 = inlined_call_operand.hbm [shape: f32[1,128], index: 2, kind: input, shape index: {}]   ;;  %s579_s3 = inlined_call_operand.hbm [shape: f32[8,128], index: 3, kind: output, shape index: {0}]   ;;  %s580_s4 = inlined_call_operand.hbm [shape: f32[1,128], index: 4, kind: output, shape index: {1}]   ;;  %s581_s5 = inlined_call_operand.hbm [shape: f32[1,128], index: 5, kind: output, shape index: {2}]  }
   0x1   :  { %12 = vsyncpa [#allocation6], 0 }
   0x2   :  { %13 = vsyncpa [#allocation4], 0 }
   0x3   :  { %14 = vsyncpa [#allocation10], 0  ;;  %s455_s18 = smov [#allocation5]   ;;  %s315_s22 = scalar_lea.hbm %s577_s1, 2048 }
   0x4   :  { %s33_s19 = sshll.u32 %s455_s18, 4  ;;  %p316_p0 = scmp.ne.s32.totalorder %s577_s1, %s315_s22  ;;  %s34_s19 = int_to_ptr.vmem [resolvable:$true] %s33_s19 }
   0x5   :  { %p319_p1 = scmp.lt.u32.totalorder %s315_s22, %s577_s1 }
   0x7   :  { %p321_p2 = pnand %p319_p1, %p316_p0 }
   0x9   :  { %324 = shalt.err (!%p321_p2)
}
   0xa   :  { %s325_s27 = scalar_lea.vmem %s34_s19, 2048  ;;  %p330_p4 = scmp.lt.s32.totalorder %s34_s19, %s34_s19 }
   0xb   :  { %p326_p3 = scmp.ne.s32.totalorder %s34_s19, %s325_s27  ;;  %p331_p5 = scmp.lt.s32.totalorder %s325_s27, %s325_s27 }
   0xd   :  { %p332_p6 = por %p331_p5, %p330_p4 }
   0xf   :  { %p333_p7 = pnand %p332_p6, %p326_p3 }
  0x11   :  { %336 = shalt.err (!%p333_p7)
}
  0x12   :  { %s456_s28 = smov 128   ;;  %s457_s29 = smov 8  }
  0x13   :  { %39 = dma.hbm_to_vmem [thread:$0]  %s577_s1, 2048, %s34_s19, [#allocation6], %s456_s28, %s456_s28, %s457_s29  }
  0x14   :  { %s458_s7 = smov [#allocation2]   ;;  %s459_s9 = smov [#allocation7]  }
  0x15   :  { %s24_s8 = sshll.u32 %s458_s7, 4  ;;  %s46_s10 = sshll.u32 %s459_s9, 4  ;;  %s25_s8 = int_to_ptr.vmem [resolvable:$true] %s24_s8  ;;  %s47_s10 = int_to_ptr.vmem [resolvable:$true] %s46_s10 }
  0x16   :  { %s337_s13 = scalar_lea.hbm %s576_s0, 128 }
  0x17   :  { %p338_p8 = scmp.ne.s32.totalorder %s576_s0, %s337_s13  ;;  %p341_p9 = scmp.lt.u32.totalorder %s337_s13, %s576_s0 }
  0x19   :  { %p343_p10 = pnand %p341_p9, %p338_p8 }
  0x1b   :  { %346 = shalt.err (!%p343_p10)
}
  0x1c   :  { %s347_s1 = scalar_lea.vmem %s25_s8, 128  ;;  %p352_p12 = scmp.lt.s32.totalorder %s25_s8, %s25_s8 }
  0x1d   :  { %p348_p11 = scmp.ne.s32.totalorder %s25_s8, %s347_s1  ;;  %p353_p13 = scmp.lt.s32.totalorder %s347_s1, %s347_s1 }
  0x1f   :  { %p354_p0 = por %p353_p13, %p352_p12 }
  0x21   :  { %p355_p1 = pnand %p354_p0, %p348_p11 }
  0x23   :  { %358 = shalt.err (!%p355_p1)
}
  0x24   :  { %27 = dma.hbm_to_vmem [thread:$0]  %s576_s0, 128, %s25_s8, [#allocation3]  }
  0x25   :  { %s359_s22 = scalar_lea.hbm %s578_s2, 16 }
  0x26   :  { %p360_p2 = scmp.ne.s32.totalorder %s578_s2, %s359_s22  ;;  %p363_p3 = scmp.lt.u32.totalorder %s359_s22, %s578_s2 }
  0x28   :  { %p365_p4 = pnand %p363_p3, %p360_p2 }
  0x2a   :  { %368 = shalt.err (!%p365_p4)
}
  0x2b   :  { %s369_s27 = scalar_lea.vmem %s47_s10, 16  ;;  %s373_s28 = scalar_lea.vmem %s47_s10, 32 }
  0x2c   :  { %p370_p5 = scmp.ne.s32.totalorder %s47_s10, %s369_s27  ;;  %p374_p6 = scmp.lt.s32.totalorder %s47_s10, %s47_s10 }
  0x2d   :  { %p375_p7 = scmp.lt.s32.totalorder %s373_s28, %s369_s27 }
  0x2f   :  { %p376_p8 = por %p375_p7, %p374_p6 }
  0x31   :  { %p377_p9 = pnand %p376_p8, %p370_p5 }
  0x33   :  { %380 = shalt.err (!%p377_p9)
}
  0x34   :  { %49 = dma.hbm_to_vmem [thread:$0]  %s578_s2, 16, %s47_s10, [#allocation6]  }
  0x35   :  { %447 = dma.done.wait [#allocation3], 128  }
  0x36   :  { %448 = vsyncadd [#allocation3], 4294967168 }
  0x37   :  { %449 = dma.done.wait [#allocation6], 2064  }
  0x38   :  { %450 = vsyncadd [#allocation6], 4294965232  ;;  %v460_v0 = vmov 0.0|0.0   ;;  %vm461_vm0 = vmmov 0   ;;  %v462_v1 = vmov 0.0   ;;  %v62_v2 = vld [vmem:[#allocation5] sm:$0xff] }
  0x39   :  { %280 = vmatprep.subr.bf16.mxu0 %v460_v0  ;;  %277 = vmatprep.mubr.msk.f32.mxu0 %vm461_vm0, %v462_v1  ;;  %159 = vst [vmem:[#allocation9] sm:$0x1] %v462_v1  ;;  %160 = vst [vmem:[#allocation11] sm:$0x1] %v462_v1  ;;  %v63_v3 = vld [vmem:[#allocation5 + $0x8] sm:$0xff]  ;;  %v64_v4 = vld [vmem:[#allocation5 + $0x10] sm:$0xff] }
  0x3a   :  { %v281_v5 = vpack.c.bf16 %v63_v3, %v62_v2  ;;  %v65_v6 = vld [vmem:[#allocation5 + $0x18] sm:$0xff]  ;;  %v66_v8 = vld [vmem:[#allocation5 + $0x20] sm:$0xff]  ;;  %v67_v9 = vld [vmem:[#allocation5 + $0x28] sm:$0xff]  ;;  %s463_s2 = smov [#allocation8]  }
  0x3b   :  { %v284_v7 = vpack.c.bf16 %v65_v6, %v64_v4  ;;  %v287_v10 = vpack.c.bf16 %v67_v9, %v66_v8  ;;  %v68_v11 = vld [vmem:[#allocation5 + $0x30] sm:$0xff]  ;;  %v69_v12 = vld [vmem:[#allocation5 + $0x38] sm:$0xff]  ;;  %v70_v14 = vld [vmem:[#allocation5 + $0x40] sm:$0xff]  ;;  %s190_s30 = sshll.u32 %s463_s2, 4  ;;  %s191_s30 = int_to_ptr.vmem [resolvable:$true] %s190_s30 }
  0x3c   :  { %282 = vmatpush3.bf16.msra.mxu0 %v281_v5  ;;  %v290_v13 = vpack.c.bf16 %v69_v12, %v68_v11  ;;  %v71_v15 = vld [vmem:[#allocation5 + $0x48] sm:$0xff]  ;;  %v72_v17 = vld [vmem:[#allocation5 + $0x50] sm:$0xff]  ;;  %v73_v18 = vld [vmem:[#allocation5 + $0x58] sm:$0xff]  ;;  %s381_s6 = scalar_lea.vmem %s191_s30, 128  ;;  %p386_p11 = scmp.lt.s32.totalorder %s191_s30, %s191_s30 }
  0x3d   :  { %283 = vmatprep.subr.bf16.mxu0 %v460_v0  ;;  %v293_v16 = vpack.c.bf16 %v71_v15, %v70_v14  ;;  %v296_v19 = vpack.c.bf16 %v73_v18, %v72_v17  ;;  %v74_v20 = vld [vmem:[#allocation5 + $0x60] sm:$0xff]  ;;  %v75_v21 = vld [vmem:[#allocation5 + $0x68] sm:$0xff]  ;;  %v76_v23 = vld [vmem:[#allocation5 + $0x70] sm:$0xff]  ;;  %p382_p10 = scmp.ne.s32.totalorder %s191_s30, %s381_s6  ;;  %p387_p12 = scmp.lt.s32.totalorder %s381_s6, %s381_s6 }
  0x3e   :  { %v299_v22 = vpack.c.bf16 %v75_v21, %v74_v20  ;;  %v77_v24 = vld [vmem:[#allocation5 + $0x78] sm:$0xff]  ;;  %v227_v27 = vld [vmem:[#allocation7] ss:$0 sm:$0xff] }
  0x3f   :  { %v302_v25 = vpack.c.bf16 %v77_v24, %v76_v23  ;;  %v61_v26 = vld [vmem:[#allocation2] sm:$0xff]  ;;  %p388_p13 = por %p387_p12, %p386_p11 }
  0x40   :  { %285 = vmatpush3.bf16.msra.mxu0 %v284_v7 }
  0x41   :  { %286 = vmatprep.subr.bf16.mxu0 %v460_v0  ;;  %p389_p0 = pnand %p388_p13, %p382_p10 }
  0x44   :  { %288 = vmatpush3.bf16.msra.mxu0 %v287_v10 }
  0x45   :  { %289 = vmatprep.subr.bf16.mxu0 %v460_v0 }
  0x48   :  { %291 = vmatpush3.bf16.msra.mxu0 %v290_v13 }
  0x49   :  { %292 = vmatprep.subr.bf16.mxu0 %v460_v0 }
  0x4c   :  { %294 = vmatpush3.bf16.msra.mxu0 %v293_v16 }
  0x4d   :  { %295 = vmatprep.subr.bf16.mxu0 %v460_v0 }
  0x50   :  { %297 = vmatpush3.bf16.msra.mxu0 %v296_v19 }
  0x51   :  { %298 = vmatprep.subr.bf16.mxu0 %v460_v0 }
  0x54   :  { %300 = vmatpush3.bf16.msra.mxu0 %v299_v22 }
  0x55   :  { %301 = vmatprep.subr.bf16.mxu0 %v460_v0 }
  0x58   :  { %303 = vmatpush3.bf16.msra.mxu0 %v302_v25 }
  0x5b   :  { %278 = vmatmul.mubr.f32.vlgmr.msra.gmra.mrb[0].mxu0 %v61_v26 }
 0x12e   :  { %v151_v28 = vpop.f32.mrb[0].mxu0 }
 0x12f   :  { %v152_v29 = vadd.f32 %v227_v27, %v151_v28  ;;  %v279_v30 = vpop.f32.mrb[1].mxu0 }
 0x131   :  { %v162_v31 = vrot.slane %v152_v29, 4  ;;  %v171_v32 = vmul.f32 %v152_v29, %v152_v29  ;;  %180 = vst [vmem:[#allocation8] sm:$0xff] %v152_v29 }
 0x132   :  { %392 = shalt.err (!%p389_p0)
}
 0x133   :  { %s393_s9 = scalar_lea.hbm %s579_s3, 128 }
 0x134   :  { %p394_p1 = scmp.ne.s32.totalorder %s579_s3, %s393_s9  ;;  %p397_p2 = scmp.lt.u32.totalorder %s393_s9, %s579_s3 }
 0x136   :  { %p399_p3 = pnand %p397_p2, %p394_p1 }
 0x138   :  { %402 = shalt.err (!%p399_p3)
}
 0x139   :  { %193 = dma.vmem_to_hbm [thread:$0]  %s191_s30, 128, %s579_s3, [#allocation4]   ;;  %v163_v33 = vadd.f32 %v162_v31, %v152_v29  ;;  %v172_v34 = vrot.slane %v171_v32, 4  ;;  %v161_v41 = vld [vmem:[#allocation9] sm:$0x1] }
 0x13a   :  { %s464_s16 = smov [#allocation9]   ;;  %v170_v44 = vld [vmem:[#allocation11] sm:$0x1]  ;;  %s465_s1 = smov [#allocation11]  }
 0x13b   :  { %v164_v35 = vrot.slane %v163_v33, 2  ;;  %v173_v36 = vadd.f32 %v172_v34, %v171_v32  ;;  %s200_s17 = sshll.u32 %s464_s16, 4  ;;  %s210_s18 = sshll.u32 %s465_s1, 4  ;;  %s201_s17 = int_to_ptr.vmem [resolvable:$true] %s200_s17  ;;  %s544_s18 = int_to_ptr.vmem [resolvable:$true] %s210_s18 }
 0x13c   :  { %s403_s3 = scalar_lea.vmem %s201_s17, 16  ;;  %s407_s19 = scalar_lea.vmem %s201_s17, 32 }
 0x13d   :  { %v165_v37 = vadd.f32 %v164_v35, %v163_v33  ;;  %v174_v38 = vrot.slane %v173_v36, 2  ;;  %p404_p4 = scmp.ne.s32.totalorder %s201_s17, %s403_s3  ;;  %p408_p5 = scmp.lt.s32.totalorder %s201_s17, %s201_s17 }
 0x13e   :  { %p409_p6 = scmp.lt.s32.totalorder %s407_s19, %s403_s3 }
 0x13f   :  { %v166_v39 = vrot.slane %v165_v37, 1  ;;  %v175_v40 = vadd.f32 %v174_v38, %v173_v36 }
 0x140   :  { %p410_p7 = por %p409_p6, %p408_p5 }
 0x141   :  { %v167_v42 = vadd.f32 %v166_v39, %v165_v37  ;;  %v176_v43 = vrot.slane %v175_v40, 1 }
 0x142   :  { %p411_p8 = pnand %p410_p7, %p404_p4 }
 0x143   :  { %v168_v45 = vadd.f32 %v167_v42, %v161_v41  ;;  %v177_v46 = vadd.f32 %v176_v43, %v175_v40 }
 0x145   :  { %169 = vst [vmem:[#allocation9] sm:$0x1] %v168_v45  ;;  %v178_v47 = vadd.f32 %v177_v46, %v170_v44 }
 0x146   :  { %414 = shalt.err (!%p411_p8)
}
 0x147   :  { %s415_s22 = scalar_lea.hbm %s580_s4, 16 }
 0x148   :  { %p416_p9 = scmp.ne.s32.totalorder %s580_s4, %s415_s22  ;;  %p419_p10 = scmp.lt.u32.totalorder %s415_s22, %s580_s4 }
 0x14a   :  { %p421_p11 = pnand %p419_p10, %p416_p9 }
 0x14c   :  { %424 = shalt.err (!%p421_p11)
}
 0x14d   :  { %203 = dma.vmem_to_hbm [thread:$0]  %s201_s17, 16, %s580_s4, [#allocation10]   ;;  %179 = vst [vmem:[#allocation11] sm:$0x1] %v178_v47 }
 0x14e   :  { %s425_s0 = scalar_lea.vmem %s544_s18, 16  ;;  %s429_s29 = scalar_lea.vmem %s544_s18, 32 }
 0x14f   :  { %p426_p12 = scmp.ne.s32.totalorder %s544_s18, %s425_s0  ;;  %p430_p13 = scmp.lt.s32.totalorder %s544_s18, %s544_s18 }
 0x150   :  { %p431_p0 = scmp.lt.s32.totalorder %s429_s29, %s425_s0 }
 0x152   :  { %p432_p1 = por %p431_p0, %p430_p13 }
 0x154   :  { %p433_p2 = pnand %p432_p1, %p426_p12 }
 0x156   :  { %436 = shalt.err (!%p433_p2)
}
 0x157   :  { %s437_s6 = scalar_lea.hbm %s581_s5, 16 }
 0x158   :  { %p438_p3 = scmp.ne.s32.totalorder %s581_s5, %s437_s6  ;;  %p441_p4 = scmp.lt.u32.totalorder %s437_s6, %s581_s5 }
 0x15a   :  { %p443_p5 = pnand %p441_p4, %p438_p3 }
 0x15c   :  { %446 = shalt.err (!%p443_p5)
}
 0x15d   :  { %213 = dma.vmem_to_hbm [thread:$0]  %s544_s18, 16, %s581_s5, [#allocation10]  }
 0x15e   :  { %451 = dma.done.wait [#allocation4], 128  }
 0x15f   :  { %452 = vsyncadd [#allocation4], 4294967168 }
 0x160   :  { %453 = dma.done.wait [#allocation10], 32  }
 0x161   :  { %454 = vsyncadd [#allocation10], 4294967264 }
 0x162   :  { %223 = vsyncpa [#allocation3], 1 }
 0x163   :  { %224 = vsyncpa [#allocation6], 1 }
 0x164   :  { %225 = vsyncpa [#allocation4], 1 }
 0x165   :  { %226 = vsyncpa [#allocation10], 1 }

</bundles_post_ra>
